<compile_context>
chip_gen: v7x
topology: tpu7x:2x2x1
jax: 0.10.0
libtpu: 0.0.40
codegen_flags: <defaults>
</compile_context>

<pallas_src>
import jax
import jax.numpy as jnp
from jax.experimental import pallas as pl
from jax.experimental.pallas import tpu as pltpu


LANE = 128  # TPU lane width


def _round_up(x, m):
    return -(-x // m) * m


def _pick_batch_tile(B):
    # Largest MXU-friendly row tile (multiple of the 8-sublane vreg height,
    # capped at 256 rows for the 256-wide v6e/v7x MXU).  Tiny batches run as a
    # single full block (block == full array dim is always layout-legal).
    if B < 8:
        return B
    return min(256, (B // 8) * 8)


def prepare_pooler_params(weight, bias):
    """One-time (load-time) parameter prep.

    weight: [H_out, H_in] like nn.Linear, bias: [H_out].
    Returns (w_t, b2d):
      w_t: [Hi, Ho] bf16, pre-transposed (kernel computes x @ w_t),
           zero-padded to lane multiples on both dims.
      b2d: [1, Ho] f32, zero-padded.
    """
    H_out, H_in = weight.shape
    Hi = _round_up(H_in, LANE)
    Ho = _round_up(H_out, LANE)
    w_t = jnp.zeros((Hi, Ho), jnp.float32).at[:H_in, :H_out].set(weight.T)
    b2d = jnp.zeros((1, Ho), jnp.float32).at[0, :H_out].set(bias)
    return w_t.astype(jnp.bfloat16), b2d


def pooler_kernel(x_ref, w_ref, b_ref, o_ref):
    # x_ref: [TB, Hi] first-token activations (input dtype)
    # w_ref: [Hi, Ho] bf16 (pre-transposed, padded)  -- VMEM-resident
    # b_ref: [1, Ho]  f32
    # o_ref: [TB, Ho]
    x = x_ref[...].astype(jnp.bfloat16)            # VPU cast -> MXU-native operand
    y = jnp.dot(x, w_ref[...], preferred_element_type=jnp.float32) + b_ref[...]
    o_ref[...] = jnp.tanh(y).astype(o_ref.dtype)   # tanh runs on the EUP


def bert_pooler(hidden_states, w_t, b2d):
    """hidden_states: [B, S, H]; w_t/b2d from prepare_pooler_params.

    Returns tanh(hidden_states[:, 0] @ W.T + b): [B, H].
    """
    B, S, H = hidden_states.shape
    Hi, Ho = w_t.shape
    assert Hi >= H and Ho >= H, "padded weight smaller than hidden size"

    TB = _pick_batch_tile(B)
    grid = (pl.cdiv(B, TB),)

    # Fused first-token slice: view [B, S, H] as [B, S*H] (free reshape) and
    # DMA only the leading lane-aligned Hi columns of each row.
    if S * H >= Hi:
        x2d = hidden_states.reshape(B, S * H)
    else:
        # Tiny-demo corner (S*H < 128): explicit slice + pad instead.
        x2d = jnp.pad(hidden_states[:, 0, :], ((0, 0), (0, Hi - H)))

    itemsize = jnp.dtype(hidden_states.dtype).itemsize
    cost = pl.CostEstimate(
        flops=2 * B * Hi * Ho,
        transcendentals=B * Ho,
        bytes_accessed=B * Hi * itemsize + Hi * Ho * 2 + Ho * 4 + B * Ho * itemsize,
    )

    out = pl.pallas_call(
        pooler_kernel,
        out_shape=jax.ShapeDtypeStruct((B, Ho), hidden_states.dtype),
        grid_spec=pl.GridSpec(
            grid=grid,
            in_specs=[
                # First-token rows only (strided window over the batch dim).
                pl.BlockSpec((TB, Hi), lambda i: (i, 0)),
                # Weight: constant index_map -> DMA'd once, stays VMEM-resident.
                pl.BlockSpec((Hi, Ho), lambda i: (0, 0)),
                # Bias.
                pl.BlockSpec((1, Ho), lambda i: (0, 0)),
            ],
            # Lane-dense (128-multiple) output -> unmasked vector stores.
            out_specs=pl.BlockSpec((TB, Ho), lambda i: (i, 0)),
        ),
        compiler_params=pltpu.CompilerParams(
            # Batch axis is embarrassingly parallel -> lets v7x split it across
            # its two TensorCores; a no-op on single-TC v5e/v6e.
            dimension_semantics=("parallel",),
        ),
        cost_estimate=cost,
    )(x2d, w_t, b2d)

    # No-op when H is already a multiple of 128 (real BERT hidden sizes).
    return out[:, :H]


if __name__ == "__main__":
    B, S, H = 2, 8, 32  # batch, seq, hidden_size (demo scale)

    key = jax.random.PRNGKey(0)
    k_x, k_w, k_b = jax.random.split(key, 3)

    hidden_states = jax.random.normal(k_x, (B, S, H), dtype=jnp.float32)
    # nn.Linear-shaped params: weight [H_out, H_in], bias [H_out].
    weight = jax.random.normal(k_w, (H, H), dtype=jnp.float32) * (1.0 / jnp.sqrt(H))
    bias = jax.random.normal(k_b, (H,), dtype=jnp.float32) * 0.01

    # One-time parameter prep (transpose + pad + bf16 cast), then the hot call.
    w_t, b2d = prepare_pooler_params(weight, bias)
    out = jax.jit(bert_pooler)(hidden_states, w_t, b2d)
    out = jax.block_until_ready(out)

    # References.
    x0 = hidden_states[:, 0, :]
    ref_f32 = jnp.tanh(x0 @ weight.T + bias)
    ref_bf16 = jnp.tanh(
        x0.astype(jnp.bfloat16).astype(jnp.float32)
        @ weight.T.astype(jnp.bfloat16).astype(jnp.float32)
        + bias
    )

    assert out.shape == (B, H)
    assert out.dtype == hidden_states.dtype
    # Tight check against a matched mixed-precision (bf16 in, f32 accum) reference.
    assert jnp.allclose(out, ref_bf16, atol=1e-4, rtol=1e-4), "mismatch vs bf16 reference"
    # Loose check against the pure-f32 PyTorch-equivalent reference.
    assert jnp.allclose(out, ref_f32, atol=2e-2, rtol=2e-2), "mismatch vs f32 reference"

    print("KERNEL_OK")
</pallas_src>

<mosaic_0001>
module attributes {stable_mosaic.version = 11 : i64} {
  func.func @pooler_kernel(%arg0: i32, %arg1: memref<2x128xf32, #tpu.memory_space<vmem>>, %arg2: memref<128x128xbf16, #tpu.memory_space<vmem>>, %arg3: memref<1x128xf32, #tpu.memory_space<vmem>>, %arg4: memref<2x128xf32, #tpu.memory_space<vmem>>) attributes {dimension_semantics = [#tpu.dimension_semantics<parallel>], iteration_bounds = array<i64: 1>, scalar_prefetch = 0 : i64, scratch_operands = 0 : i64, tpu.core_type = #tpu.core_type<tc>, window_params = [{transform_indices = @transform_0, window_bounds = array<i64: 2, 128>}, {pipeline_mode = #tpu.pipeline_mode<synchronous>, transform_indices = @transform_1, window_bounds = array<i64: 128, 128>}, {pipeline_mode = #tpu.pipeline_mode<synchronous>, transform_indices = @transform_2, window_bounds = array<i64: 1, 128>}, {transform_indices = @transform_3, window_bounds = array<i64: 2, 128>}]} {
    %c0 = arith.constant 0 : index
    %c0_0 = arith.constant 0 : index
    %0 = vector.load %arg1[%c0, %c0_0] : memref<2x128xf32, #tpu.memory_space<vmem>>, vector<2x128xf32>
    %1 = arith.truncf %0 : vector<2x128xf32> to vector<2x128xbf16>
    %c0_1 = arith.constant 0 : index
    %c0_2 = arith.constant 0 : index
    %2 = vector.load %arg2[%c0_1, %c0_2] : memref<128x128xbf16, #tpu.memory_space<vmem>>, vector<128x128xbf16>
    %cst = arith.constant dense<0.000000e+00> : vector<2x128xf32>
    %3 = tpu.matmul %1, %2, %cst {dimension_numbers = #tpu.dot_dimension_numbers<[1], [0], [0], [1], [0, 0, 1, 1], [], []>} : vector<2x128xbf16>, vector<128x128xbf16>, vector<2x128xf32> -> vector<2x128xf32>
    %c0_3 = arith.constant 0 : index
    %c0_4 = arith.constant 0 : index
    %4 = vector.load %arg3[%c0_3, %c0_4] : memref<1x128xf32, #tpu.memory_space<vmem>>, vector<1x128xf32>
    %5 = vector.broadcast %4 : vector<1x128xf32> to vector<2x128xf32>
    %6 = arith.addf %3, %5 : vector<2x128xf32>
    %7 = math.tanh %6 : vector<2x128xf32>
    %c0_5 = arith.constant 0 : index
    %c0_6 = arith.constant 0 : index
    %8 = vector.load %arg4[%c0_5, %c0_6] : memref<2x128xf32, #tpu.memory_space<vmem>>, vector<2x128xf32>
    tpu.vector_store %arg4[%c0_5, %c0_6], %7 {strides = array<i32>} : memref<2x128xf32, #tpu.memory_space<vmem>>, vector<2x128xf32>,
    return
  }
  func.func @transform_0(%arg0: i32) -> (i32, i32) {
    %c0_i32 = arith.constant 0 : i32
    %c0_i32_0 = arith.constant 0 : i32
    return %arg0, %c0_i32 : i32, i32
  }
  func.func @transform_1(%arg0: i32) -> (i32, i32) {
    %c0_i32 = arith.constant 0 : i32
    %c0_i32_0 = arith.constant 0 : i32
    %c0_i32_1 = arith.constant 0 : i32
    return %c0_i32, %c0_i32_0 : i32, i32
  }
  func.func @transform_2(%arg0: i32) -> (i32, i32) {
    %c0_i32 = arith.constant 0 : i32
    %c0_i32_0 = arith.constant 0 : i32
    %c0_i32_1 = arith.constant 0 : i32
    return %c0_i32, %c0_i32_0 : i32, i32
  }
  func.func @transform_3(%arg0: i32) -> (i32, i32) {
    %c0_i32 = arith.constant 0 : i32
    %c0_i32_0 = arith.constant 0 : i32
    return %arg0, %c0_i32 : i32, i32
  }
}

</mosaic_0001>

<bundles_post_ra>
// kernel: bert_pooler.1
= control target key start
LH: loop header
LB: loop body
LE: loop exit
PB: predicated region body
PF: predicated region fallthrough
CT: control target
= control target key end

     0   :  { %8 = vsyncpa [#allocation3], 0  ;;  %s318_s0 = inlined_call_operand.vmem [shape: f32[2,256], index: 0, kind: input, shape index: {}]   ;;  %s319_s1 = inlined_call_operand.hbm [shape: bf16[128,128], index: 1, kind: input, shape index: {}]   ;;  %s320_s2 = inlined_call_operand.vmem [shape: f32[1,128], index: 2, kind: input, shape index: {}]   ;;  %s321_s3 = inlined_call_operand.hbm [shape: f32[2,128], index: 3, kind: output, shape index: {}]  }
   0x1   :  { %9 = vsyncpa [#allocation4], 0  ;;  %s262_s12 = smov [#allocation2]   ;;  %s214_s16 = scalar_lea.hbm %s319_s1, 1024 }
   0x2   :  { %s17_s13 = sshll.u32 %s262_s12, 4  ;;  %p215_p0 = scmp.ne.s32.totalorder %s319_s1, %s214_s16  ;;  %s18_s13 = int_to_ptr.vmem [resolvable:$true] %s17_s13 }
   0x3   :  { %p218_p1 = scmp.lt.u32.totalorder %s214_s16, %s319_s1 }
   0x5   :  { %p220_p2 = pnand %p218_p1, %p215_p0 }
   0x7   :  { %223 = shalt.err (!%p220_p2)
}
   0x8   :  { %s224_s21 = scalar_lea.vmem %s18_s13, 1024  ;;  %p229_p4 = scmp.lt.s32.totalorder %s18_s13, %s18_s13 }
   0x9   :  { %p225_p3 = scmp.ne.s32.totalorder %s18_s13, %s224_s21  ;;  %p230_p5 = scmp.lt.s32.totalorder %s224_s21, %s224_s21 }
   0xb   :  { %p231_p6 = por %p230_p5, %p229_p4 }
   0xd   :  { %p232_p7 = pnand %p231_p6, %p225_p3 }
   0xf   :  { %235 = shalt.err (!%p232_p7)
}
  0x10   :  { %s263_s22 = smov 64   ;;  %s264_s23 = smov 4  }
  0x11   :  { %23 = dma.hbm_to_vmem [thread:$0]  %s319_s1, 1024, %s18_s13, [#allocation3], %s263_s22, %s263_s22, %s264_s23  }
  0x12   :  { %258 = dma.done.wait [#allocation3], 1024  }
  0x13   :  { %259 = vsyncadd [#allocation3], 4294966272  ;;  %v265_v0 = vmov 0.0   ;;  %vm266_vm0 = vmmov 0   ;;  %v204_v1 = vld [vmem:[#allocation2] sm:$0xff]   ;;  %v205_v2 = vld [vmem:[#allocation2 + $0x8] sm:$0xff]  }
  0x14   :  { %178 = vmatprep.subr.bf16.mxu0 %v265_v0  ;;  %194 = vmatprep.mubr.msk.bf16.mxu0 %vm266_vm0, %v265_v0  ;;  %v206_v3 = vld [vmem:[#allocation2 + $0x10] sm:$0xff]   ;;  %v207_v4 = vld [vmem:[#allocation2 + $0x18] sm:$0xff]   ;;  %v208_v5 = vld [vmem:[#allocation2 + $0x20] sm:$0xff]   ;;  %s267_s29 = smov [#allocation5]  }
  0x15   :  { %179 = vmatpush3.bf16.msra.mxu0 %v204_v1  ;;  %v209_v6 = vld [vmem:[#allocation2 + $0x28] sm:$0xff]   ;;  %v210_v7 = vld [vmem:[#allocation2 + $0x30] sm:$0xff]   ;;  %v211_v8 = vld [vmem:[#allocation2 + $0x38] sm:$0xff]   ;;  %s151_s30 = sshll.u32 %s267_s29, 4  ;;  %s152_s30 = int_to_ptr.vmem [resolvable:$true] %s151_s30 }
  0x16   :  { %180 = vmatprep.subr.bf16.mxu0 %v265_v0  ;;  %v30_v9 = vld [vmem:[%s318_s0] sm:$0x3]  ;;  %s236_s0 = scalar_lea.vmem %s152_s30, 32  ;;  %p241_p9 = scmp.lt.s32.totalorder %s152_s30, %s152_s30 }
  0x17   :  { %v31_v10 = vpack.c.bf16 %v30_v9, %v30_v9  ;;  %v160_v11 = vld [vmem:[%s320_s2] ss:$0 sm:$0xff]  ;;  %p237_p8 = scmp.ne.s32.totalorder %s152_s30, %s236_s0  ;;  %p242_p10 = scmp.lt.s32.totalorder %s236_s0, %s236_s0 }
  0x19   :  { %181 = vmatpush3.bf16.msra.mxu0 %v205_v2  ;;  %p243_p11 = por %p242_p10, %p241_p9 }
  0x1a   :  { %182 = vmatprep.subr.bf16.mxu0 %v265_v0 }
  0x1b   :  { %p244_p12 = pnand %p243_p11, %p237_p8 }
  0x1d   :  { %183 = vmatpush3.bf16.msra.mxu0 %v206_v3 }
  0x1e   :  { %184 = vmatprep.subr.bf16.mxu0 %v265_v0 }
  0x21   :  { %185 = vmatpush3.bf16.msra.mxu0 %v207_v4 }
  0x22   :  { %186 = vmatprep.subr.bf16.mxu0 %v265_v0 }
  0x25   :  { %187 = vmatpush3.bf16.msra.mxu0 %v208_v5 }
  0x26   :  { %188 = vmatprep.subr.bf16.mxu0 %v265_v0 }
  0x29   :  { %189 = vmatpush3.bf16.msra.mxu0 %v209_v6 }
  0x2a   :  { %190 = vmatprep.subr.bf16.mxu0 %v265_v0 }
  0x2d   :  { %191 = vmatpush3.bf16.msra.mxu0 %v210_v7 }
  0x2e   :  { %192 = vmatprep.subr.bf16.mxu0 %v265_v0 }
  0x31   :  { %193 = vmatpush3.bf16.msra.mxu0 %v211_v8 }
  0x34   :  { %195 = vmatmul.mubr.bf16.vlgmr.msra.gmra.mrb[0].mxu0 %v31_v10 }
 0x107   :  { %v137_v12 = vpop.f32.mrb[0].mxu0 }
 0x108   :  { %v138_v13 = vadd.f32 %v160_v11, %v137_v12  ;;  %v196_v14 = vpop.f32.mrb[1].mxu0 }
 0x109   :  { %v140_v15 = vpop.f32.mrb[2].mxu0 }
 0x10a   :  { %212 = vtanh.f32 %v138_v13  ;;  %v197_v16 = vpop.f32.mrb[3].mxu0 }
 0x114   :  { %v213_v17 = vpop.eup %212 }
 0x115   :  { %144 = vst [vmem:[#allocation5] sm:$0x3] %v213_v17 }
 0x116   :  { %247 = shalt.err (!%p244_p12)
}
 0x117   :  { %s248_s5 = scalar_lea.hbm %s321_s3, 32 }
 0x118   :  { %p249_p13 = scmp.ne.s32.totalorder %s321_s3, %s248_s5  ;;  %p252_p0 = scmp.lt.u32.totalorder %s248_s5, %s321_s3 }
 0x11a   :  { %p254_p1 = pnand %p252_p0, %p249_p13 }
 0x11c   :  { %257 = shalt.err (!%p254_p1)
}
 0x11d   :  { %154 = dma.vmem_to_hbm [thread:$0]  %s152_s30, 32, %s321_s3, [#allocation4]  }
 0x11e   :  { %260 = dma.done.wait [#allocation4], 32  }
 0x11f   :  { %261 = vsyncadd [#allocation4], 4294967264 }
 0x120   :  { %158 = vsyncpa [#allocation3], 1 }
 0x121   :  { %159 = vsyncpa [#allocation4], 1 }

</bundles_post_ra>
